<compile_context>
chip_gen: v5e
topology: v5e:2x2
jax: 0.10.0
libtpu: 0.0.40
codegen_flags: <defaults>
</compile_context>

<pallas_src>
import functools

import jax
import jax.numpy as jnp
import numpy as np
from jax.experimental import pallas as pl
from jax.experimental.pallas import tpu as pltpu


def _round_up(a, m):
    return ((a + m - 1) // m) * m


def _lane_exist_kernel(x_ref, w1_ref, b1_ref, w2_ref, b2_ref, out_ref,
                       *, apply_sigmoid):
    """Fused (pool-folded) MLP for one batch tile.

    x_ref  : (TB, K)   f32    flattened NCHW input tile, K = C*H*W
    w1_ref : (K, 128)  bf16   pool-folded linear1 weight (VMEM resident)
    b1_ref : (1, 128)  f32
    w2_ref : (128, NP) bf16   lane-padded linear2 weight (VMEM resident)
    b2_ref : (1, NP)   f32
    out_ref: (TB, NP)  bf16
    """
    # In-kernel cast to bf16 (VPU, free next to the MXU) instead of a host pass.
    x = x_ref[...].astype(w1_ref.dtype)
    # Linear1 (pool already folded into the weight), f32 accumulation on MXU.
    h = jnp.dot(x, w1_ref[...], preferred_element_type=jnp.float32)
    # Bias + ReLU in f32 on the VPU (v5e-safe).
    h = jnp.maximum(h + b1_ref[...], 0.0)
    # Linear2: bf16 operands, f32 accumulation.
    y = jnp.dot(h.astype(w2_ref.dtype), w2_ref[...],
                preferred_element_type=jnp.float32) + b2_ref[...]
    if apply_sigmoid:
        y = jax.nn.sigmoid(y)  # EUP slot; effectively free next to the matmuls
    out_ref[...] = y.astype(out_ref.dtype)  # bf16 store -> half the writeback


def prepare_simple_lane_exist_params(w1, b1, w2, b2, *, channels, height, width):
    """One-time host-side weight prep (hoisted out of the per-call path).

    Folds AvgPool2d(2,2) into linear1's weight, lane-pads linear2 to a multiple
    of 128, casts matmul operands to bf16. Call once, reuse for every forward.
    Returns (params_dict, num_output).
    """
    assert height % 2 == 0 and width % 2 == 0, "AvgPool2d(2,2) assumes even H, W"
    Hp, Wp = height // 2, width // 2
    flattened = channels * Hp * Wp
    hidden = w1.shape[1]
    num_output = w2.shape[1]
    assert w1.shape == (flattened, hidden)

    K = channels * height * width
    # W_eff[(c, h, w), :] = 0.25 * W1[(c, h//2, w//2), :]
    w1_chw = jnp.asarray(w1, jnp.float32).reshape(channels, Hp, Wp, hidden)
    w_eff = 0.25 * jnp.broadcast_to(w1_chw[:, :, None, :, None, :],
                                    (channels, Hp, 2, Wp, 2, hidden))
    w_eff = w_eff.reshape(K, hidden).astype(jnp.bfloat16)

    NP = _round_up(num_output, 128)  # lane-pad -> unmasked epilogue vst
    w2_p = jnp.pad(jnp.asarray(w2, jnp.float32),
                   ((0, 0), (0, NP - num_output))).astype(jnp.bfloat16)
    b2_p = jnp.pad(jnp.asarray(b2, jnp.float32),
                   (0, NP - num_output)).reshape(1, NP)
    b1_2d = jnp.asarray(b1, jnp.float32).reshape(1, hidden)

    params = dict(w_eff=w_eff, b1=b1_2d, w2_p=w2_p, b2_p=b2_p)
    return params, num_output


def simple_lane_exist_forward(x_nchw, params, *, num_output, predict=False,
                              batch_tile=512):
    """x_nchw: (B, C, H, W) f32; params from prepare_simple_lane_exist_params."""
    w_eff, b1_2d = params["w_eff"], params["b1"]
    w2_p, b2_p = params["w2_p"], params["b2_p"]

    B, C, H, W = x_nchw.shape
    K, hidden = w_eff.shape
    NP = w2_p.shape[1]
    assert K == C * H * W, "prepared params do not match the input spatial shape"

    # Contiguous NCHW flatten: layout-preserving, no data movement; keep f32.
    x_flat = x_nchw.reshape(B, K)

    # ---- batch tile selection ------------------------------------------------
    # Big enough to amortize per-grid-step overhead, small enough that the
    # double-buffered f32 x tile + (double-buffered) resident weights fit VMEM
    # on every generation (v7x: 64 MiB physical).
    vmem_budget = 48 * 1024 * 1024
    fixed_bytes = (2 * (K * hidden * 2) + 2 * (hidden * NP * 2)
                   + 2 * (hidden * 4) + 2 * (NP * 4))
    per_row_bytes = 2 * (K * 4) + 2 * (NP * 2)  # dbl-buffered x (f32) + out (bf16)
    tb_cap = max(8, ((vmem_budget - fixed_bytes) // per_row_bytes) // 8 * 8)
    bt = max(8, _round_up(batch_tile, 8))
    TB = max(8, min(bt, _round_up(B, 8), tb_cap))
    grid = (pl.cdiv(B, TB),)  # no batch pad: Pallas masks the ragged tail block

    vmem_limit = min(64 * 1024 * 1024,
                     max(32 * 1024 * 1024,
                         fixed_bytes + TB * per_row_bytes + (4 << 20)))

    flops = 2 * B * K * hidden + 2 * B * hidden * NP
    transcendentals = B * NP if predict else 0
    bytes_accessed = (x_flat.size * 4 + w_eff.size * 2 + w2_p.size * 2
                      + b1_2d.size * 4 + b2_p.size * 4 + B * NP * 2)

    kernel = functools.partial(_lane_exist_kernel, apply_sigmoid=predict)
    out_padded = pl.pallas_call(
        kernel,
        out_shape=jax.ShapeDtypeStruct((B, NP), jnp.bfloat16),
        grid_spec=pltpu.PrefetchScalarGridSpec(
            num_scalar_prefetch=0,
            grid=grid,
            in_specs=[
                pl.BlockSpec((TB, K), lambda i: (i, 0)),        # x tile (pipelined)
                pl.BlockSpec((K, hidden), lambda i: (0, 0)),    # W_eff (resident)
                pl.BlockSpec((1, hidden), lambda i: (0, 0)),    # b1
                pl.BlockSpec((hidden, NP), lambda i: (0, 0)),   # W2 (lane-padded)
                pl.BlockSpec((1, NP), lambda i: (0, 0)),        # b2 (lane-padded)
            ],
            out_specs=pl.BlockSpec((TB, NP), lambda i: (i, 0)),
        ),
        compiler_params=pltpu.CompilerParams(
            dimension_semantics=("parallel",),   # v7x: split batch tiles across 2 TCs
            vmem_limit_bytes=int(vmem_limit),
        ),
        cost_estimate=pl.CostEstimate(
            flops=flops,
            transcendentals=transcendentals,
            bytes_accessed=bytes_accessed,
        ),
    )(x_flat, w_eff, b1_2d, w2_p, b2_p)

    # strip lane padding, return f32 to match the PyTorch module's output dtype
    return out_padded[:, :num_output].astype(jnp.float32)


def _reference(x, w1, b1, w2, b2, predict):
    B, C, H, W = x.shape
    pooled = x.reshape(B, C, H // 2, 2, W // 2, 2).mean(axis=(3, 5))
    flat = pooled.reshape(B, -1)
    h = jnp.maximum(flat @ w1 + b1, 0.0)
    y = h @ w2 + b2
    if predict:
        y = jax.nn.sigmoid(y)
    return y


if __name__ == "__main__":
    # small shapes consistent with the module: NCHW input, flattened_size = C*(H/2)*(W/2)
    B, C, H, W = 2, 4, 16, 16
    flattened_size = C * (H // 2) * (W // 2)   # 256
    num_output = 4

    key = jax.random.PRNGKey(0)
    kx, k1, kb1, k2, kb2 = jax.random.split(key, 5)

    x = jax.random.normal(kx, (B, C, H, W), dtype=jnp.float32)

    # deterministic Linear init (PyTorch-style uniform +-1/sqrt(fan_in)), stored as (in, out)
    bound1 = 1.0 / np.sqrt(flattened_size)
    w1 = jax.random.uniform(k1, (flattened_size, 128), jnp.float32, -bound1, bound1)
    b1 = jax.random.uniform(kb1, (128,), jnp.float32, -bound1, bound1)
    bound2 = 1.0 / np.sqrt(128)
    w2 = jax.random.uniform(k2, (128, num_output), jnp.float32, -bound2, bound2)
    b2 = jax.random.uniform(kb2, (num_output,), jnp.float32, -bound2, bound2)

    # One-time weight prep (pool fold, lane pad, bf16 cast) — per-call path is
    # just the fused kernel + tiny slice/cast.
    params, n_out = prepare_simple_lane_exist_params(
        w1, b1, w2, b2, channels=C, height=H, width=W)
    params = jax.block_until_ready(params)

    fwd = jax.jit(simple_lane_exist_forward,
                  static_argnames=("num_output", "predict", "batch_tile"))

    for predict in (False, True):
        out = fwd(x, params, num_output=n_out, predict=predict)
        out = jax.block_until_ready(out)
        ref = _reference(x, w1, b1, w2, b2, predict)
        # bf16 matmul operands / bf16 output store (f32 accumulation) => loose tolerance
        np.testing.assert_allclose(np.asarray(out), np.asarray(ref),
                                   rtol=2e-2, atol=2e-2)

    print("KERNEL_OK")
</pallas_src>

<mosaic_0001>
module attributes {stable_mosaic.version = 11 : i64} {
  func.func @_lane_exist_kernel(%arg0: i32, %arg1: memref<8x1024xf32, #tpu.memory_space<vmem>>, %arg2: memref<1024x128xbf16, #tpu.memory_space<vmem>>, %arg3: memref<1x128xf32, #tpu.memory_space<vmem>>, %arg4: memref<128x128xbf16, #tpu.memory_space<vmem>>, %arg5: memref<1x128xf32, #tpu.memory_space<vmem>>, %arg6: memref<8x128xbf16, #tpu.memory_space<vmem>>) attributes {dimension_semantics = [#tpu.dimension_semantics<parallel>], iteration_bounds = array<i64: 1>, scalar_prefetch = 0 : i64, scratch_operands = 0 : i64, tpu.core_type = #tpu.core_type<tc>, window_params = [{transform_indices = @transform_0, window_bounds = array<i64: 8, 1024>}, {pipeline_mode = #tpu.pipeline_mode<synchronous>, transform_indices = @transform_1, window_bounds = array<i64: 1024, 128>}, {pipeline_mode = #tpu.pipeline_mode<synchronous>, transform_indices = @transform_2, window_bounds = array<i64: 1, 128>}, {pipeline_mode = #tpu.pipeline_mode<synchronous>, transform_indices = @transform_3, window_bounds = array<i64: 128, 128>}, {pipeline_mode = #tpu.pipeline_mode<synchronous>, transform_indices = @transform_4, window_bounds = array<i64: 1, 128>}, {transform_indices = @transform_5, window_bounds = array<i64: 8, 128>}]} {
    %c0 = arith.constant 0 : index
    %c0_0 = arith.constant 0 : index
    %0 = vector.load %arg1[%c0, %c0_0] : memref<8x1024xf32, #tpu.memory_space<vmem>>, vector<8x1024xf32>
    %1 = arith.truncf %0 : vector<8x1024xf32> to vector<8x1024xbf16>
    %c0_1 = arith.constant 0 : index
    %c0_2 = arith.constant 0 : index
    %2 = vector.load %arg2[%c0_1, %c0_2] : memref<1024x128xbf16, #tpu.memory_space<vmem>>, vector<1024x128xbf16>
    %cst = arith.constant dense<0.000000e+00> : vector<8x128xf32>
    %3 = tpu.matmul %1, %2, %cst {dimension_numbers = #tpu.dot_dimension_numbers<[1], [0], [0], [1], [0, 0, 1, 1], [], []>} : vector<8x1024xbf16>, vector<1024x128xbf16>, vector<8x128xf32> -> vector<8x128xf32>
    %c0_3 = arith.constant 0 : index
    %c0_4 = arith.constant 0 : index
    %4 = vector.load %arg3[%c0_3, %c0_4] : memref<1x128xf32, #tpu.memory_space<vmem>>, vector<1x128xf32>
    %5 = vector.broadcast %4 : vector<1x128xf32> to vector<8x128xf32>
    %6 = arith.addf %3, %5 : vector<8x128xf32>
    %cst_5 = arith.constant 0.000000e+00 : f32
    %7 = vector.broadcast %cst_5 : f32 to vector<8x128xf32>
    %8 = arith.maximumf %6, %7 : vector<8x128xf32>
    %9 = arith.truncf %8 : vector<8x128xf32> to vector<8x128xbf16>
    %c0_6 = arith.constant 0 : index
    %c0_7 = arith.constant 0 : index
    %10 = vector.load %arg4[%c0_6, %c0_7] : memref<128x128xbf16, #tpu.memory_space<vmem>>, vector<128x128xbf16>
    %cst_8 = arith.constant dense<0.000000e+00> : vector<8x128xf32>
    %11 = tpu.matmul %9, %10, %cst_8 {dimension_numbers = #tpu.dot_dimension_numbers<[1], [0], [0], [1], [0, 0, 1, 1], [], []>} : vector<8x128xbf16>, vector<128x128xbf16>, vector<8x128xf32> -> vector<8x128xf32>
    %c0_9 = arith.constant 0 : index
    %c0_10 = arith.constant 0 : index
    %12 = vector.load %arg5[%c0_9, %c0_10] : memref<1x128xf32, #tpu.memory_space<vmem>>, vector<1x128xf32>
    %13 = vector.broadcast %12 : vector<1x128xf32> to vector<8x128xf32>
    %14 = arith.addf %11, %13 : vector<8x128xf32>
    %15 = arith.truncf %14 : vector<8x128xf32> to vector<8x128xbf16>
    %c0_11 = arith.constant 0 : index
    %c0_12 = arith.constant 0 : index
    %16 = vector.load %arg6[%c0_11, %c0_12] : memref<8x128xbf16, #tpu.memory_space<vmem>>, vector<8x128xbf16>
    tpu.vector_store %arg6[%c0_11, %c0_12], %15 {strides = array<i32>} : memref<8x128xbf16, #tpu.memory_space<vmem>>, vector<8x128xbf16>,
    return
  }
  func.func @transform_0(%arg0: i32) -> (i32, i32) {
    %c0_i32 = arith.constant 0 : i32
    %c0_i32_0 = arith.constant 0 : i32
    return %arg0, %c0_i32 : i32, i32
  }
  func.func @transform_1(%arg0: i32) -> (i32, i32) {
    %c0_i32 = arith.constant 0 : i32
    %c0_i32_0 = arith.constant 0 : i32
    %c0_i32_1 = arith.constant 0 : i32
    return %c0_i32, %c0_i32_0 : i32, i32
  }
  func.func @transform_2(%arg0: i32) -> (i32, i32) {
    %c0_i32 = arith.constant 0 : i32
    %c0_i32_0 = arith.constant 0 : i32
    %c0_i32_1 = arith.constant 0 : i32
    return %c0_i32, %c0_i32_0 : i32, i32
  }
  func.func @transform_3(%arg0: i32) -> (i32, i32) {
    %c0_i32 = arith.constant 0 : i32
    %c0_i32_0 = arith.constant 0 : i32
    %c0_i32_1 = arith.constant 0 : i32
    return %c0_i32, %c0_i32_0 : i32, i32
  }
  func.func @transform_4(%arg0: i32) -> (i32, i32) {
    %c0_i32 = arith.constant 0 : i32
    %c0_i32_0 = arith.constant 0 : i32
    %c0_i32_1 = arith.constant 0 : i32
    return %c0_i32, %c0_i32_0 : i32, i32
  }
  func.func @transform_5(%arg0: i32) -> (i32, i32) {
    %c0_i32 = arith.constant 0 : i32
    %c0_i32_0 = arith.constant 0 : i32
    return %arg0, %c0_i32 : i32, i32
  }
}

</mosaic_0001>

<bundles_post_ra>
// kernel: simple_lane_exist_forward.1
= control target key start
LH: loop header
LB: loop body
LE: loop exit
PB: predicated region body
PF: predicated region fallthrough
CT: control target
= control target key end

     0   :  { %10 = vsyncpa [#allocation3], 0  ;;  %s1254_s21 = smov [#allocation2]   ;;  %s1255_s23 = smov 64   ;;  %s1347_s0 = inlined_call_operand.vmem [shape: f32[2,1024], index: 0, kind: input, shape index: {}]   ;;  %s1348_s1 = inlined_call_operand.hbm [shape: bf16[1024,128], index: 1, kind: input, shape index: {}]   ;;  %s1349_s2 = inlined_call_operand.vmem [shape: f32[1,128], index: 2, kind: input, shape index: {}]   ;;  %s1350_s3 = inlined_call_operand.vmem [shape: bf16[128,128], index: 3, kind: input, shape index: {}]   ;;  %s1351_s4 = inlined_call_operand.vmem [shape: f32[1,128], index: 4, kind: input, shape index: {}]   ;;  %s1352_s5 = inlined_call_operand.vmem [shape: bf16[2,128], index: 5, kind: output, shape index: {}]  }
   0x1   :  { %s17_s20 = sshll.u32 %s1348_s1, 4  ;;  %s19_s22 = sshll.u32 %s1254_s21, 4  ;;  %s18_s20 = int_to_ptr.hbm [resolvable:$true] %s17_s20  ;;  %s20_s22 = int_to_ptr.vmem [resolvable:$true] %s19_s22 }
   0x2   :  { %s1256_s24 = smov 4  }
   0x3   :  { %25 = dma.hbm_to_vmem [thread:$0]  %s18_s20, 8192, %s20_s22, [#allocation3], %s1255_s23, %s1255_s23, %s1256_s24  }
   0x4   :  { %1252 = dma.done.wait [#allocation3], 8192  }
   0x5   :  { %1253 = vsyncadd [#allocation3], 4294959104  ;;  %v1158_v0 = vld [vmem:[#allocation2 + $0x38] sm:$0xff]  ;;  %v1157_v4 = vld [vmem:[#allocation2 + $0x30] sm:$0xff]  ;;  %vm797_vm0 = vcmask 1040384  }
   0x6   :  { %v1166_v1 = vld [vmem:[#allocation2 + $0x78] sm:$0xff]  ;;  %607 = vmatpush.bf16.msra.mxu0 %v1158_v0  ;;  %v1165_v5 = vld [vmem:[#allocation2 + $0x70] sm:$0xff]  ;;  %v1156_v8 = vld [vmem:[#allocation2 + $0x28] sm:$0xff] }
   0x7   :  { %v1174_v2 = vld [vmem:[#allocation2 + $0xb8] sm:$0xff]  ;;  %620 = vmatpush.bf16.msra.mxu1 %v1166_v1  ;;  %v1173_v6 = vld [vmem:[#allocation2 + $0xb0] sm:$0xff]  ;;  %v1164_v9 = vld [vmem:[#allocation2 + $0x68] sm:$0xff] }
   0x8   :  { %v1182_v3 = vld [vmem:[#allocation2 + $0xf8] sm:$0xff]  ;;  %633 = vmatpush.bf16.msra.mxu2 %v1174_v2  ;;  %v1181_v7 = vld [vmem:[#allocation2 + $0xf0] sm:$0xff]  ;;  %v1172_v10 = vld [vmem:[#allocation2 + $0xa8] sm:$0xff] }
   0x9   :  { %646 = vmatpush.bf16.msra.mxu3 %v1182_v3  ;;  %v1180_v11 = vld [vmem:[#allocation2 + $0xe8] sm:$0xff]  ;;  %v1155_v12 = vld [vmem:[#allocation2 + $0x20] sm:$0xff]  ;;  %v1154_v16 = vld [vmem:[#allocation2 + $0x18] sm:$0xff] }
   0xa   :  { %608 = vmatpush.bf16.msra.mxu0 %v1157_v4  ;;  %v1163_v13 = vld [vmem:[#allocation2 + $0x60] sm:$0xff]  ;;  %v36_v17 = vld [vmem:[%s1347_s0] sm:$0xff]  ;;  %v38_v18 = vld [vmem:[%s1347_s0 + $0x10] sm:$0xff] }
   0xb   :  { %621 = vmatpush.bf16.msra.mxu1 %v1165_v5  ;;  %v1171_v14 = vld [vmem:[#allocation2 + $0xa0] sm:$0xff]  ;;  %v1162_v19 = vld [vmem:[#allocation2 + $0x58] sm:$0xff]  ;;  %v42_v21 = vld [vmem:[%s1347_s0 + $0x30] sm:$0xff]  ;;  %52 = vst [vmem:[#allocation1] ss:$4 sm:$0xff] %v36_v17 }
   0xc   :  { %634 = vmatpush.bf16.msra.mxu2 %v1173_v6  ;;  %v1179_v15 = vld [vmem:[#allocation2 + $0xe0] sm:$0xff]  ;;  %v40_v20 = vld [vmem:[%s1347_s0 + $0x20] sm:$0xff]  ;;  %54 = vst [vmem:[#allocation1 + $0x1] ss:$4 sm:$0xff] %v38_v18  ;;  %v1153_v24 = vld [vmem:[#allocation2 + $0x10] sm:$0xff] }
   0xd   :  { %647 = vmatpush.bf16.msra.mxu3 %v1181_v7  ;;  %v1170_v22 = vld [vmem:[#allocation2 + $0x98] sm:$0xff]  ;;  %56 = vst [vmem:[#allocation1 + $0x2] ss:$4 sm:$0xff] %v40_v20  ;;  %v1161_v25 = vld [vmem:[#allocation2 + $0x50] sm:$0xff]  ;;  %v37_v28 = vld [vmem:[%s1347_s0 + $0x8] sm:$0xff] }
   0xe   :  { %609 = vmatpush.bf16.msra.mxu0 %v1156_v8  ;;  %v1178_v23 = vld [vmem:[#allocation2 + $0xd8] sm:$0xff]  ;;  %58 = vst [vmem:[#allocation1 + $0x3] ss:$4 sm:$0xff] %v42_v21  ;;  %v1169_v26 = vld [vmem:[#allocation2 + $0x90] sm:$0xff]  ;;  %v1152_v30 = vld [vmem:[#allocation2 + $0x8] sm:$0xff] }
   0xf   :  { %622 = vmatpush.bf16.msra.mxu1 %v1164_v9  ;;  %v1177_v27 = vld [vmem:[#allocation2 + $0xd0] sm:$0xff]  ;;  %v1160_v31 = vld [vmem:[#allocation2 + $0x48] sm:$0xff]  ;;  %60 = vst [vmem:[#allocation1 + $0x20] ss:$4 sm:$0xff] %v37_v28  ;;  %v41_v34 = vld [vmem:[%s1347_s0 + $0x28] sm:$0xff] }
  0x10   :  { %635 = vmatpush.bf16.msra.mxu2 %v1172_v10  ;;  %v39_v29 = vld [vmem:[%s1347_s0 + $0x18] sm:$0xff]  ;;  %v1168_v32 = vld [vmem:[#allocation2 + $0x88] sm:$0xff]  ;;  %v1151_v35 = vld [vmem:[#allocation2] sm:$0xff]  ;;  %64 = vst [vmem:[#allocation1 + $0x22] ss:$4 sm:$0xff] %v41_v34 }
  0x11   :  { %648 = vmatpush.bf16.msra.mxu3 %v1180_v11  ;;  %v1176_v33 = vld [vmem:[#allocation2 + $0xc8] sm:$0xff]  ;;  %62 = vst [vmem:[#allocation1 + $0x21] ss:$4 sm:$0xff] %v39_v29  ;;  %v43_v36 = vld [vmem:[%s1347_s0 + $0x38] sm:$0xff]  ;;  %v1159_v37 = vld [vmem:[#allocation2 + $0x40] sm:$0xff] }
  0x12   :  { %610 = vmatpush.bf16.msra.mxu0 %v1155_v12  ;;  %v1167_v38 = vld [vmem:[#allocation2 + $0x80] sm:$0xff]  ;;  %v1190_v40 = vld [vmem:[#allocation2 + $0x138] sm:$0xff]  ;;  %66 = vst [vmem:[#allocation1 + $0x23] ss:$4 sm:$0xff] %v43_v36  ;;  %v1189_v52 = vld [vmem:[#allocation2 + $0x130] sm:$0xff] }
  0x13   :  { %623 = vmatpush.bf16.msra.mxu1 %v1163_v13  ;;  %v1175_v39 = vld [vmem:[#allocation2 + $0xc0] sm:$0xff]  ;;  %v1198_v42 = vld [vmem:[#allocation2 + $0x178] sm:$0xff]  ;;  %v1197_v53 = vld [vmem:[#allocation2 + $0x170] sm:$0xff] }
  0x14   :  { %636 = vmatpush.bf16.msra.mxu2 %v1171_v14  ;;  %v1206_v46 = vld [vmem:[#allocation2 + $0x1b8] sm:$0xff]  ;;  %v1205_v54 = vld [vmem:[#allocation2 + $0x1b0] sm:$0xff]  ;;  %v1188_v56 = vld [vmem:[#allocation2 + $0x128] sm:$0xff] }
  0x15   :  { %649 = vmatpush.bf16.msra.mxu3 %v1179_v15  ;;  %v69_v41 = vld.sshfl [vmem:[#allocation1 + $0x10] sm:$0xff pattern:$0x73625140]  ;;  %v67_v43 = vld.sshfl [vmem:[#allocation1] sm:$0xff pattern:$0x73625140] }
  0x16   :  { %611 = vmatpush.bf16.msra.mxu0 %v1154_v16  ;;  %v70_v44 = vld.sshfl [vmem:[#allocation1 + $0x18] sm:$0xff pattern:$0x73625140]  ;;  %v68_v45 = vld.sshfl [vmem:[#allocation1 + $0x8] sm:$0xff pattern:$0x73625140]  ;;  %v85_v48 = vpack.c.bf16 %v69_v41, %v69_v41  ;;  %v83_v49 = vpack.c.bf16 %v67_v43, %v67_v43 }
  0x17   :  { %624 = vmatpush.bf16.msra.mxu1 %v1162_v19  ;;  %v1214_v47 = vld [vmem:[#allocation2 + $0x1f8] sm:$0xff]  ;;  %v86_v50 = vpack.c.bf16 %v70_v44, %v70_v44  ;;  %v84_v51 = vpack.c.bf16 %v68_v45, %v68_v45  ;;  %v1213_v55 = vld [vmem:[#allocation2 + $0x1f0] sm:$0xff]  ;;  %v1196_v57 = vld [vmem:[#allocation2 + $0x168] sm:$0xff] }
  0x18   :  { %637 = vmatpush.bf16.msra.mxu2 %v1170_v22  ;;  %v1204_v58 = vld [vmem:[#allocation2 + $0x1a8] sm:$0xff]  ;;  %v1187_v60 = vld [vmem:[#allocation2 + $0x120] sm:$0xff]  ;;  %v1186_v0 = vld [vmem:[#allocation2 + $0x118] sm:$0xff] }
  0x19   :  { %650 = vmatpush.bf16.msra.mxu3 %v1178_v23  ;;  %v1212_v59 = vld [vmem:[#allocation2 + $0x1e8] sm:$0xff]  ;;  %v1195_v61 = vld [vmem:[#allocation2 + $0x160] sm:$0xff]  ;;  %v1194_v1 = vld [vmem:[#allocation2 + $0x158] sm:$0xff] }
  0x1a   :  { %612 = vmatpush.bf16.msra.mxu0 %v1153_v24  ;;  %v1203_v62 = vld [vmem:[#allocation2 + $0x1a0] sm:$0xff]  ;;  %v1202_v2 = vld [vmem:[#allocation2 + $0x198] sm:$0xff]  ;;  %v1185_v4 = vld [vmem:[#allocation2 + $0x110] sm:$0xff] }
  0x1b   :  { %625 = vmatpush.bf16.msra.mxu1 %v1161_v25  ;;  %v1211_v63 = vld [vmem:[#allocation2 + $0x1e0] sm:$0xff]  ;;  %v1210_v3 = vld [vmem:[#allocation2 + $0x1d8] sm:$0xff]  ;;  %v1193_v5 = vld [vmem:[#allocation2 + $0x150] sm:$0xff] }
  0x1c   :  { %638 = vmatpush.bf16.msra.mxu2 %v1169_v26  ;;  %v1201_v6 = vld [vmem:[#allocation2 + $0x190] sm:$0xff]  ;;  %v1184_v8 = vld [vmem:[#allocation2 + $0x108] sm:$0xff]  ;;  %v1183_v12 = vld [vmem:[#allocation2 + $0x100] sm:$0xff] }
  0x1d   :  { %651 = vmatpush.bf16.msra.mxu3 %v1177_v27  ;;  %v1209_v7 = vld [vmem:[#allocation2 + $0x1d0] sm:$0xff]  ;;  %v1192_v9 = vld [vmem:[#allocation2 + $0x148] sm:$0xff]  ;;  %v1191_v13 = vld [vmem:[#allocation2 + $0x140] sm:$0xff] }
  0x1e   :  { %613 = vmatpush.bf16.msra.mxu0 %v1152_v30  ;;  %v1200_v10 = vld [vmem:[#allocation2 + $0x188] sm:$0xff]  ;;  %v1199_v14 = vld [vmem:[#allocation2 + $0x180] sm:$0xff]  ;;  %v71_v16 = vld.sshfl [vmem:[#allocation1 + $0x20] sm:$0xff pattern:$0x73625140] }
  0x1f   :  { %626 = vmatpush.bf16.msra.mxu1 %v1160_v31  ;;  %v1208_v11 = vld [vmem:[#allocation2 + $0x1c8] sm:$0xff]  ;;  %v1207_v15 = vld [vmem:[#allocation2 + $0x1c0] sm:$0xff]  ;;  %v74_v19 = vld.sshfl [vmem:[#allocation1 + $0x38] sm:$0xff pattern:$0x73625140]  ;;  %v87_v20 = vpack.c.bf16 %v71_v16, %v71_v16 }
  0x20   :  { %639 = vmatpush.bf16.msra.mxu2 %v1168_v32  ;;  %v72_v17 = vld.sshfl [vmem:[#allocation1 + $0x28] sm:$0xff pattern:$0x73625140]  ;;  %v73_v18 = vld.sshfl [vmem:[#allocation1 + $0x30] sm:$0xff pattern:$0x73625140]  ;;  %v90_v23 = vpack.c.bf16 %v74_v19, %v74_v19 }
  0x21   :  { %652 = vmatpush.bf16.msra.mxu3 %v1176_v33  ;;  %v88_v21 = vpack.c.bf16 %v72_v17, %v72_v17  ;;  %v89_v22 = vpack.c.bf16 %v73_v18, %v73_v18  ;;  %v1222_v24 = vld [vmem:[%s1350_s3 + $0x38] sm:$0xff]  ;;  %v1221_v25 = vld [vmem:[%s1350_s3 + $0x30] sm:$0xff]  ;;  %v1220_v26 = vld [vmem:[%s1350_s3 + $0x28] sm:$0xff] }
  0x22   :  { %614 = vmatpush.bf16.msra.mxu0 %v1151_v35  ;;  %v1219_v27 = vld [vmem:[%s1350_s3 + $0x20] sm:$0xff]  ;;  %v1218_v28 = vld [vmem:[%s1350_s3 + $0x18] sm:$0xff]  ;;  %v1217_v30 = vld [vmem:[%s1350_s3 + $0x10] sm:$0xff] }
  0x23   :  { %627 = vmatpush.bf16.msra.mxu1 %v1159_v37  ;;  %v1216_v32 = vld [vmem:[%s1350_s3 + $0x8] sm:$0xff]  ;;  %v1215_v36 = vld [vmem:[%s1350_s3] sm:$0xff] }
  0x24   :  { %640 = vmatpush.bf16.msra.mxu2 %v1167_v38  ;;  %v1226_v38 = vld [vmem:[%s1349_s2] ss:$0 sm:$0xff] }
  0x25   :  { %653 = vmatpush.bf16.msra.mxu3 %v1175_v39  ;;  %615 = vmatmul.bf16.vlgmr.msra.gmra.mxu0 %v83_v49 }
  0x26   :  { %659 = vmatpush.bf16.msrb.mxu0 %v1190_v40  ;;  %628 = vmatmul.bf16.vlgmr.msra.gmra.mxu1 %v84_v51 }
  0x27   :  { %672 = vmatpush.bf16.msrb.mxu1 %v1198_v42  ;;  %641 = vmatmul.bf16.vlgmr.msra.gmra.mxu2 %v85_v48 }
  0x28   :  { %685 = vmatpush.bf16.msrb.mxu2 %v1206_v46  ;;  %654 = vmatmul.bf16.vlgmr.msra.gmra.mxu3 %v86_v50 }
  0x29   :  { %698 = vmatpush.bf16.msrb.mxu3 %v1214_v47 }
  0x2a   :  { %660 = vmatpush.bf16.msrb.mxu0 %v1189_v52 }
  0x2b   :  { %673 = vmatpush.bf16.msrb.mxu1 %v1197_v53 }
  0x2c   :  { %686 = vmatpush.bf16.msrb.mxu2 %v1205_v54 }
  0x2d   :  { %699 = vmatpush.bf16.msrb.mxu3 %v1213_v55 }
  0x2e   :  { %661 = vmatpush.bf16.msrb.mxu0 %v1188_v56 }
  0x2f   :  { %674 = vmatpush.bf16.msrb.mxu1 %v1196_v57 }
  0x30   :  { %687 = vmatpush.bf16.msrb.mxu2 %v1204_v58 }
  0x31   :  { %700 = vmatpush.bf16.msrb.mxu3 %v1212_v59  ;;  %v1227_v59 = vld [vmem:[%s1351_s4] ss:$0 sm:$0xff] }
  0x32   :  { %662 = vmatpush.bf16.msrb.mxu0 %v1187_v60 }
  0x33   :  { %675 = vmatpush.bf16.msrb.mxu1 %v1195_v61 }
  0x34   :  { %688 = vmatpush.bf16.msrb.mxu2 %v1203_v62 }
  0x35   :  { %701 = vmatpush.bf16.msrb.mxu3 %v1211_v63 }
  0x36   :  { %663 = vmatpush.bf16.msrb.mxu0 %v1186_v0 }
  0x37   :  { %676 = vmatpush.bf16.msrb.mxu1 %v1194_v1 }
  0x38   :  { %689 = vmatpush.bf16.msrb.mxu2 %v1202_v2 }
  0x39   :  { %702 = vmatpush.bf16.msrb.mxu3 %v1210_v3 }
  0x3a   :  { %664 = vmatpush.bf16.msrb.mxu0 %v1185_v4 }
  0x3b   :  { %677 = vmatpush.bf16.msrb.mxu1 %v1193_v5 }
  0x3c   :  { %690 = vmatpush.bf16.msrb.mxu2 %v1201_v6 }
  0x3d   :  { %703 = vmatpush.bf16.msrb.mxu3 %v1209_v7 }
  0x3e   :  { %665 = vmatpush.bf16.msrb.mxu0 %v1184_v8 }
  0x3f   :  { %678 = vmatpush.bf16.msrb.mxu1 %v1192_v9 }
  0x40   :  { %691 = vmatpush.bf16.msrb.mxu2 %v1200_v10 }
  0x41   :  { %704 = vmatpush.bf16.msrb.mxu3 %v1208_v11 }
  0x42   :  { %666 = vmatpush.bf16.msrb.mxu0 %v1183_v12 }
  0x43   :  { %679 = vmatpush.bf16.msrb.mxu1 %v1191_v13 }
  0x44   :  { %692 = vmatpush.bf16.msrb.mxu2 %v1199_v14 }
  0x45   :  { %705 = vmatpush.bf16.msrb.mxu3 %v1207_v15  ;;  %667 = vmatmul.bf16.vlgmr.msrb.gmra.mxu0 %v87_v20 }
  0x46   :  { %680 = vmatmul.bf16.vlgmr.msrb.gmra.mxu1 %v88_v21  ;;  %781 = vmatpush.bf16.msra.mxu0 %v1222_v24 }
  0x47   :  { %693 = vmatmul.bf16.vlgmr.msrb.gmra.mxu2 %v89_v22 }
  0x48   :  { %706 = vmatmul.bf16.vlgmr.msrb.gmra.mxu3 %v90_v23 }
  0x4a   :  { %782 = vmatpush.bf16.msra.mxu0 %v1221_v25 }
  0x4e   :  { %783 = vmatpush.bf16.msra.mxu0 %v1220_v26 }
  0x52   :  { %784 = vmatpush.bf16.msra.mxu0 %v1219_v27 }
  0x56   :  { %785 = vmatpush.bf16.msra.mxu0 %v1218_v28 }
  0x5a   :  { %786 = vmatpush.bf16.msra.mxu0 %v1217_v30 }
  0x5e   :  { %787 = vmatpush.bf16.msra.mxu0 %v1216_v32 }
  0x62   :  { %788 = vmatpush.bf16.msra.mxu0 %v1215_v36 }
  0xa2   :  { %v616_v29 = vpop.f32.mrf.mxu0 }
  0xa3   :  { %v629_v31 = vpop.f32.mrf.mxu1  ;;  %v617_v41 = vadd.f32 %v1226_v38, %v616_v29 }
  0xa5   :  { %v630_v42 = vadd.f32 %v629_v31, %v617_v41 }
  0xaa   :  { %v642_v33 = vpop.f32.mrf.mxu2  ;;  %v618_v35 = vpop.f32.mrf.mxu0 }
  0xab   :  { %v655_v34 = vpop.f32.mrf.mxu3  ;;  %v631_v37 = vpop.f32.mrf.mxu1  ;;  %v643_v43 = vadd.f32 %v642_v33, %v630_v42 }
  0xad   :  { %v656_v44 = vadd.f32 %v655_v34, %v643_v43 }
  0xb2   :  { %v644_v39 = vpop.f32.mrf.mxu2 }
  0xb3   :  { %v657_v40 = vpop.f32.mrf.mxu3 }
  0xc2   :  { %v668_v45 = vpop.f32.mrf.mxu0 }
  0xc3   :  { %v681_v46 = vpop.f32.mrf.mxu1  ;;  %v669_v47 = vadd.f32 %v668_v45, %v656_v44 }
  0xc5   :  { %v682_v48 = vadd.f32 %v681_v46, %v669_v47 }
  0xca   :  { %v694_v49 = vpop.f32.mrf.mxu2  ;;  %v670_v52 = vpop.f32.mrf.mxu0 }
  0xcb   :  { %v707_v50 = vpop.f32.mrf.mxu3  ;;  %v695_v51 = vadd.f32 %v694_v49, %v682_v48  ;;  %v683_v53 = vpop.f32.mrf.mxu1 }
  0xcd   :  { %v708_v54 = vadd.f32 %v707_v50, %v695_v51 }
  0xcf   :  { %v711_v55 = vmax.f32 %v708_v54, 0.0 }
  0xd1   :  { %v712_v56 = vpack.c.bf16 %v711_v55, %v711_v55 }
  0xd2   :  { %v696_v57 = vpop.f32.mrf.mxu2 }
  0xd3   :  { %v709_v58 = vpop.f32.mrf.mxu3  ;;  %789 = vmatmul.bf16.vlgmr.msra.gmra.mxu0 %v712_v56 }
 0x150   :  { %v790_v60 = vpop.f32.mrf.mxu0 }
 0x151   :  { %v791_v61 = vadd.f32 %v1227_v59, %v790_v60 }
 0x153   :  { %v794_v62 = vpack.c.bf16 %v791_v61, %v791_v61 }
 0x155   :  { %v796_v63 = vrot.slane %v794_v62, 3 }
 0x157   :  { %v800_v0 = vsel %vm797_vm0, %v794_v62, %v796_v63 }
 0x158   :  { %817 = vst [vmem:[#allocation4] sm:$0x1] %v800_v0  ;;  %v792_v1 = vpop.f32.mrf.mxu0 }
 0x15f   :  { %v839_v2 = vld [vmem:[#allocation4] sm:$0x1] }
 0x160   :  { %840 = vst [vmem:[%s1352_s5] sm:$0x1] %v839_v2 }
 0x161   :  { %858 = vsyncpa [#allocation3], 1 }

</bundles_post_ra>
